<compile_context>
chip_gen: v7x
topology: tpu7x:2x2x1
jax: 0.10.0
libtpu: 0.0.40
codegen_flags: <defaults>
</compile_context>

<pallas_src>
import math
from functools import partial

import jax
import jax.numpy as jnp
from jax import lax
from jax.experimental import pallas as pl
from jax.experimental.pallas import tpu as pltpu


def _mha2_kernel(t1_ref, t2_ref,
                 wq_ref, bq_ref,
                 wkv_ref, bkv_ref,
                 o_ref,
                 *, num_heads, d_head, mxu_dtype):
    """Whole-problem kernel: fused QKV projections + head-batched attention."""
    d_model = num_heads * d_head
    inv_scale = 1.0 / math.sqrt(d_head)

    t1 = t1_ref[...].astype(mxu_dtype)                      # (N, D)
    t2 = t2_ref[...].astype(mxu_dtype)                      # (N, D)

    # Fused projections (PyTorch Linear: y = x @ W^T + b; weights passed here
    # already transposed to (in, out)).  MXU operands in mxu_dtype, f32
    # accumulation; bias add and scale in f32.  Folding 1/sqrt(d_head) into Q
    # (including its bias) is linear and equivalent to scaling the scores.
    q = (jnp.dot(t2, wq_ref[...].astype(mxu_dtype),
                 preferred_element_type=jnp.float32)
         + bq_ref[...]) * inv_scale                         # (N, D)   f32
    kv = (jnp.dot(t1, wkv_ref[...].astype(mxu_dtype),
                  preferred_element_type=jnp.float32)
          + bkv_ref[...])                                   # (N, 2D)  f32: [K | V]

    # One-time head-split relayout -> (H, N, Dh) head-batched layout.
    def split_heads(x, base):
        return jnp.stack(
            [x[:, base + h * d_head: base + (h + 1) * d_head]
             for h in range(num_heads)],
            axis=0)

    q3 = split_heads(q, 0).astype(mxu_dtype)                # (H, N, Dh)
    k3 = split_heads(kv, 0).astype(mxu_dtype)               # (H, N, Dh)
    v3 = split_heads(kv, d_model).astype(mxu_dtype)         # (H, N, Dh)

    # Batched scores for all heads in one MXU issue: contract Dh, batch H.
    # (No per-head K transpose — contraction is on the last dims directly.)
    s = lax.dot_general(q3, k3, (((2,), (2,)), ((0,), (0,))),
                        preferred_element_type=jnp.float32)  # (H, N, N) f32

    # Numerically-stable softmax over the key axis, once for all heads
    # (matches F.softmax).  Denominator on the EUP via approx reciprocal.
    s = s - jnp.max(s, axis=-1, keepdims=True)
    p = jnp.exp(s)
    p = p * pl.reciprocal(jnp.sum(p, axis=-1, keepdims=True), approx=True)

    # Batched context: (H, N, N) @ (H, N, Dh) -> (H, N, Dh), one MXU issue.
    o_ref[...] = lax.dot_general(p.astype(mxu_dtype), v3,
                                 (((2,), (1,)), ((0,), (0,))),
                                 preferred_element_type=jnp.float32
                                 ).astype(o_ref.dtype)


def multi_head_attention2(t1, t2, params, *, num_heads,
                          mxu_dtype=jnp.bfloat16):
    """Pallas wrapper reproducing MultiHeadAttention2.forward(t1, t2).

    t1, t2 : (N, d_model) float32
    returns: (N, 1, d_model) float32
    """
    N, d_model = t2.shape
    d_head = d_model // num_heads

    # Fuse the K and V projection weights column-wise (both consume t1).
    wkv = jnp.concatenate([params["wk"], params["wv"]], axis=1)        # (D, 2D)
    bkv = jnp.concatenate([params["bk"], params["bv"]]).reshape(1, 2 * d_model)
    bq2 = params["bq"].reshape(1, d_model)                             # (1, D)

    kernel = partial(_mha2_kernel, num_heads=num_heads, d_head=d_head,
                     mxu_dtype=mxu_dtype)

    vmem = pl.BlockSpec(memory_space=pltpu.MemorySpace.VMEM)
    o3 = pl.pallas_call(
        kernel,
        out_shape=jax.ShapeDtypeStruct((num_heads, N, d_head), jnp.float32),
        in_specs=[vmem] * 6,
        out_specs=vmem,
    )(t1, t2, params["wq"], bq2, wkv, bkv)

    # (H, N, Dh) -> (N, 1, H*Dh): final relayout done by XLA in the wrapper
    # (cheap / fused), keeping the in-kernel store a plain direct write.
    return jnp.transpose(o3, (1, 0, 2)).reshape(N, 1, d_model)


def _reference(t1, t2, params, *, num_heads):
    """Pure-JAX reference mirroring the PyTorch code path (f32 throughout)."""
    N, d_model = t2.shape
    d_head = d_model // num_heads
    q = t2 @ params["wq"] + params["bq"]                    # (N, D)
    k = t1 @ params["wk"] + params["bk"]
    v = t1 @ params["wv"] + params["bv"]
    q = q.reshape(N, num_heads, d_head).transpose(1, 0, 2)  # (H, N, Dh)
    k = k.reshape(N, num_heads, d_head).transpose(1, 2, 0)  # (H, Dh, N)
    v = v.reshape(N, num_heads, d_head).transpose(1, 0, 2)  # (H, N, Dh)
    s = jnp.matmul(q, k) / math.sqrt(d_head)                # (H, N, N)
    p = jax.nn.softmax(s, axis=-1)
    o = jnp.matmul(p, v)                                    # (H, N, Dh)
    o = o.transpose(1, 0, 2).reshape(N, 1, num_heads * d_head)
    return o


if __name__ == "__main__":
    # Small shapes consistent with the module's forward: t1, t2: (N, d_model)
    N = 8
    d_model = 32
    num_heads = 4

    key = jax.random.PRNGKey(0)
    k_t1, k_t2, k_wq, k_bq, k_wk, k_bk, k_wv, k_bv = jax.random.split(key, 8)

    t1 = jax.random.normal(k_t1, (N, d_model), dtype=jnp.float32)
    t2 = jax.random.normal(k_t2, (N, d_model), dtype=jnp.float32)

    # Deterministic synthetic parameters. Weights are stored as (in, out),
    # i.e. already-transposed relative to torch.nn.Linear's (out, in).
    scale = 1.0 / math.sqrt(d_model)
    params = {
        "wq": jax.random.uniform(k_wq, (d_model, d_model), jnp.float32, -scale, scale),
        "bq": jax.random.uniform(k_bq, (d_model,), jnp.float32, -scale, scale),
        "wk": jax.random.uniform(k_wk, (d_model, d_model), jnp.float32, -scale, scale),
        "bk": jax.random.uniform(k_bk, (d_model,), jnp.float32, -scale, scale),
        "wv": jax.random.uniform(k_wv, (d_model, d_model), jnp.float32, -scale, scale),
        "bv": jax.random.uniform(k_bv, (d_model,), jnp.float32, -scale, scale),
    }

    ref = _reference(t1, t2, params, num_heads=num_heads)

    # Exact-MXU path (f32 operands): tolerance covers only the EUP approx
    # reciprocal in the softmax denominator.
    out_f32 = multi_head_attention2(t1, t2, params, num_heads=num_heads,
                                    mxu_dtype=jnp.float32)
    out_f32 = jax.block_until_ready(out_f32)
    assert out_f32.shape == (N, 1, d_model), out_f32.shape
    assert jnp.allclose(out_f32, ref, atol=2e-3, rtol=2e-3), \
        "f32-MXU kernel mismatch vs JAX reference"

    # Recommended path: bf16 MXU operands, f32 accumulation (v5e/v6e/v7x
    # native MXU rate).  Tolerance accounts for bf16 operand rounding.
    out_bf16 = multi_head_attention2(t1, t2, params, num_heads=num_heads,
                                     mxu_dtype=jnp.bfloat16)
    out_bf16 = jax.block_until_ready(out_bf16)
    assert out_bf16.shape == (N, 1, d_model), out_bf16.shape
    assert jnp.allclose(out_bf16, ref, atol=5e-2, rtol=5e-2), \
        "bf16-MXU kernel mismatch vs JAX reference"

    print("KERNEL_OK")
</pallas_src>

<mosaic_0001>
module attributes {stable_mosaic.version = 11 : i64} {
  func.func @_mha2_kernel(%arg0: memref<8x32xf32, #tpu.memory_space<vmem>>, %arg1: memref<8x32xf32, #tpu.memory_space<vmem>>, %arg2: memref<32x32xf32, #tpu.memory_space<vmem>>, %arg3: memref<1x32xf32, #tpu.memory_space<vmem>>, %arg4: memref<32x64xf32, #tpu.memory_space<vmem>>, %arg5: memref<1x64xf32, #tpu.memory_space<vmem>>, %arg6: memref<4x8x8xf32, #tpu.memory_space<vmem>>) attributes {dimension_semantics = [], scalar_prefetch = 0 : i64, scratch_operands = 0 : i64, tpu.core_type = #tpu.core_type<tc>} {
    %c0 = arith.constant 0 : index
    %c0_0 = arith.constant 0 : index
    %0 = vector.load %arg0[%c0, %c0_0] : memref<8x32xf32, #tpu.memory_space<vmem>>, vector<8x32xf32>
    %c0_1 = arith.constant 0 : index
    %c0_2 = arith.constant 0 : index
    %1 = vector.load %arg1[%c0_1, %c0_2] : memref<8x32xf32, #tpu.memory_space<vmem>>, vector<8x32xf32>
    %c0_3 = arith.constant 0 : index
    %c0_4 = arith.constant 0 : index
    %2 = vector.load %arg2[%c0_3, %c0_4] : memref<32x32xf32, #tpu.memory_space<vmem>>, vector<32x32xf32>
    %cst = arith.constant dense<0.000000e+00> : vector<8x32xf32>
    %3 = tpu.matmul %1, %2, %cst {dimension_numbers = #tpu.dot_dimension_numbers<[1], [0], [0], [1], [0, 0, 1, 1], [], []>} : vector<8x32xf32>, vector<32x32xf32>, vector<8x32xf32> -> vector<8x32xf32>
    %c0_5 = arith.constant 0 : index
    %c0_6 = arith.constant 0 : index
    %4 = vector.load %arg3[%c0_5, %c0_6] : memref<1x32xf32, #tpu.memory_space<vmem>>, vector<1x32xf32>
    %5 = vector.broadcast %4 : vector<1x32xf32> to vector<8x32xf32>
    %6 = arith.addf %3, %5 : vector<8x32xf32>
    %cst_7 = arith.constant 0.353553385 : f32
    %7 = vector.broadcast %cst_7 : f32 to vector<8x32xf32>
    %8 = arith.mulf %6, %7 : vector<8x32xf32>
    %c0_8 = arith.constant 0 : index
    %c0_9 = arith.constant 0 : index
    %9 = vector.load %arg4[%c0_8, %c0_9] : memref<32x64xf32, #tpu.memory_space<vmem>>, vector<32x64xf32>
    %cst_10 = arith.constant dense<0.000000e+00> : vector<8x64xf32>
    %10 = tpu.matmul %0, %9, %cst_10 {dimension_numbers = #tpu.dot_dimension_numbers<[1], [0], [0], [1], [0, 0, 1, 1], [], []>} : vector<8x32xf32>, vector<32x64xf32>, vector<8x64xf32> -> vector<8x64xf32>
    %c0_11 = arith.constant 0 : index
    %c0_12 = arith.constant 0 : index
    %11 = vector.load %arg5[%c0_11, %c0_12] : memref<1x64xf32, #tpu.memory_space<vmem>>, vector<1x64xf32>
    %12 = vector.broadcast %11 : vector<1x64xf32> to vector<8x64xf32>
    %13 = arith.addf %10, %12 : vector<8x64xf32>
    %14 = vector.extract_strided_slice %8 {offsets = [0, 0], sizes = [8, 8], strides = [1, 1]} : vector<8x32xf32> to vector<8x8xf32>
    %15 = vector.extract_strided_slice %8 {offsets = [0, 8], sizes = [8, 8], strides = [1, 1]} : vector<8x32xf32> to vector<8x8xf32>
    %16 = vector.extract_strided_slice %8 {offsets = [0, 16], sizes = [8, 8], strides = [1, 1]} : vector<8x32xf32> to vector<8x8xf32>
    %17 = vector.extract_strided_slice %8 {offsets = [0, 24], sizes = [8, 8], strides = [1, 1]} : vector<8x32xf32> to vector<8x8xf32>
    %18 = vector.shape_cast %14 : vector<8x8xf32> to vector<1x8x8xf32>
    %19 = vector.shape_cast %15 : vector<8x8xf32> to vector<1x8x8xf32>
    %20 = vector.shape_cast %16 : vector<8x8xf32> to vector<1x8x8xf32>
    %21 = vector.shape_cast %17 : vector<8x8xf32> to vector<1x8x8xf32>
    %22 = tpu.concatenate %18, %19, %20, %21 in 0 : vector<1x8x8xf32>, vector<1x8x8xf32>, vector<1x8x8xf32>, vector<1x8x8xf32> -> vector<4x8x8xf32>
    %23 = vector.extract_strided_slice %13 {offsets = [0, 0], sizes = [8, 8], strides = [1, 1]} : vector<8x64xf32> to vector<8x8xf32>
    %24 = vector.extract_strided_slice %13 {offsets = [0, 8], sizes = [8, 8], strides = [1, 1]} : vector<8x64xf32> to vector<8x8xf32>
    %25 = vector.extract_strided_slice %13 {offsets = [0, 16], sizes = [8, 8], strides = [1, 1]} : vector<8x64xf32> to vector<8x8xf32>
    %26 = vector.extract_strided_slice %13 {offsets = [0, 24], sizes = [8, 8], strides = [1, 1]} : vector<8x64xf32> to vector<8x8xf32>
    %27 = vector.shape_cast %23 : vector<8x8xf32> to vector<1x8x8xf32>
    %28 = vector.shape_cast %24 : vector<8x8xf32> to vector<1x8x8xf32>
    %29 = vector.shape_cast %25 : vector<8x8xf32> to vector<1x8x8xf32>
    %30 = vector.shape_cast %26 : vector<8x8xf32> to vector<1x8x8xf32>
    %31 = tpu.concatenate %27, %28, %29, %30 in 0 : vector<1x8x8xf32>, vector<1x8x8xf32>, vector<1x8x8xf32>, vector<1x8x8xf32> -> vector<4x8x8xf32>
    %32 = vector.extract_strided_slice %13 {offsets = [0, 32], sizes = [8, 8], strides = [1, 1]} : vector<8x64xf32> to vector<8x8xf32>
    %33 = vector.extract_strided_slice %13 {offsets = [0, 40], sizes = [8, 8], strides = [1, 1]} : vector<8x64xf32> to vector<8x8xf32>
    %34 = vector.extract_strided_slice %13 {offsets = [0, 48], sizes = [8, 8], strides = [1, 1]} : vector<8x64xf32> to vector<8x8xf32>
    %35 = vector.extract_strided_slice %13 {offsets = [0, 56], sizes = [8, 8], strides = [1, 1]} : vector<8x64xf32> to vector<8x8xf32>
    %36 = vector.shape_cast %32 : vector<8x8xf32> to vector<1x8x8xf32>
    %37 = vector.shape_cast %33 : vector<8x8xf32> to vector<1x8x8xf32>
    %38 = vector.shape_cast %34 : vector<8x8xf32> to vector<1x8x8xf32>
    %39 = vector.shape_cast %35 : vector<8x8xf32> to vector<1x8x8xf32>
    %40 = tpu.concatenate %36, %37, %38, %39 in 0 : vector<1x8x8xf32>, vector<1x8x8xf32>, vector<1x8x8xf32>, vector<1x8x8xf32> -> vector<4x8x8xf32>
    %cst_13 = arith.constant dense<0.000000e+00> : vector<4x8x8xf32>
    %41 = tpu.matmul %22, %31, %cst_13 {dimension_numbers = #tpu.dot_dimension_numbers<[2], [2], [1], [1], [0, 0, 0, 1, 1, 1], [0], [0]>} : vector<4x8x8xf32>, vector<4x8x8xf32>, vector<4x8x8xf32> -> vector<4x8x8xf32>
    %cst_14 = arith.constant dense<0xFF800000> : vector<4x8xf32>
    %42 = vector.multi_reduction <maximumf>, %41, %cst_14 [2] : vector<4x8x8xf32> to vector<4x8xf32>
    %43 = vector.shape_cast %42 : vector<4x8xf32> to vector<4x8x1xf32>
    %44 = vector.broadcast %43 : vector<4x8x1xf32> to vector<4x8x8xf32>
    %45 = arith.subf %41, %44 : vector<4x8x8xf32>
    %46 = math.exp %45 : vector<4x8x8xf32>
    %cst_15 = arith.constant dense<0.000000e+00> : vector<4x8xf32>
    %47 = vector.multi_reduction <add>, %46, %cst_15 [2] : vector<4x8x8xf32> to vector<4x8xf32>
    %48 = vector.shape_cast %47 : vector<4x8xf32> to vector<4x8x1xf32>
    %49 = tpu.reciprocal %48 {approx = true} : vector<4x8x1xf32> -> vector<4x8x1xf32>
    %50 = vector.broadcast %49 : vector<4x8x1xf32> to vector<4x8x8xf32>
    %51 = arith.mulf %46, %50 : vector<4x8x8xf32>
    %cst_16 = arith.constant dense<0.000000e+00> : vector<4x8x8xf32>
    %52 = tpu.matmul %51, %40, %cst_16 {dimension_numbers = #tpu.dot_dimension_numbers<[2], [1], [1], [2], [0, 0, 0, 1, 1, 2], [0], [0]>} : vector<4x8x8xf32>, vector<4x8x8xf32>, vector<4x8x8xf32> -> vector<4x8x8xf32>
    %c0_17 = arith.constant 0 : index
    %c0_18 = arith.constant 0 : index
    %c0_19 = arith.constant 0 : index
    %53 = vector.load %arg6[%c0_17, %c0_18, %c0_19] : memref<4x8x8xf32, #tpu.memory_space<vmem>>, vector<4x8x8xf32>
    tpu.vector_store %arg6[%c0_17, %c0_18, %c0_19], %52 {strides = array<i32>} : memref<4x8x8xf32, #tpu.memory_space<vmem>>, vector<4x8x8xf32>,
    return
  }
}

</mosaic_0001>

<bundles_post_ra>
// kernel: tpu_custom_call.1
= control target key start
LH: loop header
LB: loop body
LE: loop exit
PB: predicated region body
PF: predicated region fallthrough
CT: control target
= control target key end

     0   :  { %11 = vsyncpa [#allocation3], 0  ;;  %s1381_s0 = inlined_call_operand.hbm [shape: f32[8,32], index: 0, kind: input, shape index: {}]   ;;  %s1382_s1 = inlined_call_operand.hbm [shape: f32[8,32], index: 1, kind: input, shape index: {}]   ;;  %s1383_s2 = inlined_call_operand.hbm [shape: f32[32,32], index: 2, kind: input, shape index: {}]   ;;  %s1384_s3 = inlined_call_operand.vmem [shape: f32[1,32], index: 3, kind: input, shape index: {}]   ;;  %s1385_s4 = inlined_call_operand.hbm [shape: f32[32,64], index: 4, kind: input, shape index: {}]   ;;  %s1386_s5 = inlined_call_operand.vmem [shape: f32[1,64], index: 5, kind: input, shape index: {}]   ;;  %s1387_s6 = inlined_call_operand.hbm [shape: f32[4,8,8], index: 6, kind: output, shape index: {}]  }
   0x1   :  { %12 = vsyncpa [#allocation6], 0 }
   0x2   :  { %13 = vsyncpa [#allocation9], 0 }
   0x3   :  { %14 = vsyncpa [#allocation4], 0  ;;  %s1193_s21 = smov [#allocation5]   ;;  %s1194_s23 = smov [#allocation2]  }
   0x4   :  { %s31_s22 = sshll.u32 %s1193_s21, 4  ;;  %s21_s24 = sshll.u32 %s1194_s23, 4  ;;  %s32_s22 = int_to_ptr.vmem [resolvable:$true] %s31_s22  ;;  %s22_s24 = int_to_ptr.vmem [resolvable:$true] %s21_s24 }
   0x5   :  { %s1075_s27 = scalar_lea.hbm %s1382_s1, 128 }
   0x6   :  { %p1076_p0 = scmp.ne.s32.totalorder %s1382_s1, %s1075_s27  ;;  %p1079_p1 = scmp.lt.u32.totalorder %s1075_s27, %s1382_s1 }
   0x8   :  { %p1081_p2 = pnand %p1079_p1, %p1076_p0 }
   0xa   :  { %1084 = shalt.err (!%p1081_p2)
}
   0xb   :  { %s1085_s8 = scalar_lea.vmem %s32_s22, 128  ;;  %p1090_p4 = scmp.lt.s32.totalorder %s32_s22, %s32_s22 }
   0xc   :  { %p1086_p3 = scmp.ne.s32.totalorder %s32_s22, %s1085_s8  ;;  %p1091_p5 = scmp.lt.s32.totalorder %s1085_s8, %s1085_s8 }
   0xe   :  { %p1092_p6 = por %p1091_p5, %p1090_p4 }
  0x10   :  { %p1093_p7 = pnand %p1092_p6, %p1086_p3 }
  0x12   :  { %1096 = shalt.err (!%p1093_p7)
}
  0x13   :  { %34 = dma.hbm_to_vmem [thread:$0]  %s1382_s1, 128, %s32_s22, [#allocation6]  }
  0x14   :  { %s1097_s13 = scalar_lea.hbm %s1381_s0, 128 }
  0x15   :  { %p1098_p8 = scmp.ne.s32.totalorder %s1381_s0, %s1097_s13  ;;  %p1101_p9 = scmp.lt.u32.totalorder %s1097_s13, %s1381_s0 }
  0x17   :  { %p1103_p10 = pnand %p1101_p9, %p1098_p8 }
  0x19   :  { %1106 = shalt.err (!%p1103_p10)
}
  0x1a   :  { %s1107_s18 = scalar_lea.vmem %s22_s24, 128  ;;  %p1112_p12 = scmp.lt.s32.totalorder %s22_s24, %s22_s24 }
  0x1b   :  { %p1108_p11 = scmp.ne.s32.totalorder %s22_s24, %s1107_s18  ;;  %p1113_p13 = scmp.lt.s32.totalorder %s1107_s18, %s1107_s18 }
  0x1d   :  { %p1114_p0 = por %p1113_p13, %p1112_p12 }
  0x1f   :  { %p1115_p1 = pnand %p1114_p0, %p1108_p11 }
  0x21   :  { %1118 = shalt.err (!%p1115_p1)
}
  0x22   :  { %24 = dma.hbm_to_vmem [thread:$0]  %s1381_s0, 128, %s22_s24, [#allocation3]  }
  0x23   :  { %s1195_s20 = smov [#allocation7]   ;;  %s1119_s25 = scalar_lea.hbm %s1383_s2, 512 }
  0x24   :  { %s40_s21 = sshll.u32 %s1195_s20, 4  ;;  %p1120_p2 = scmp.ne.s32.totalorder %s1383_s2, %s1119_s25  ;;  %s41_s21 = int_to_ptr.vmem [resolvable:$true] %s40_s21 }
  0x25   :  { %p1123_p3 = scmp.lt.u32.totalorder %s1119_s25, %s1383_s2 }
  0x27   :  { %p1125_p4 = pnand %p1123_p3, %p1120_p2 }
  0x29   :  { %1128 = shalt.err (!%p1125_p4)
}
  0x2a   :  { %s1129_s30 = scalar_lea.vmem %s41_s21, 512  ;;  %p1134_p6 = scmp.lt.s32.totalorder %s41_s21, %s41_s21 }
  0x2b   :  { %p1130_p5 = scmp.ne.s32.totalorder %s41_s21, %s1129_s30  ;;  %p1135_p7 = scmp.lt.s32.totalorder %s1129_s30, %s1129_s30 }
  0x2d   :  { %p1136_p8 = por %p1135_p7, %p1134_p6 }
  0x2f   :  { %p1137_p9 = pnand %p1136_p8, %p1130_p5 }
  0x31   :  { %1140 = shalt.err (!%p1137_p9)
}
  0x32   :  { %s1196_s0 = smov 128   ;;  %s1197_s24 = smov 8  }
  0x33   :  { %46 = dma.hbm_to_vmem [thread:$0]  %s1383_s2, 512, %s41_s21, [#allocation6], %s1196_s0, %s1196_s0, %s1197_s24  }
  0x34   :  { %s1198_s9 = smov [#allocation8]   ;;  %s1141_s13 = scalar_lea.hbm %s1385_s4, 512 }
  0x35   :  { %s54_s10 = sshll.u32 %s1198_s9, 4  ;;  %p1142_p10 = scmp.ne.s32.totalorder %s1385_s4, %s1141_s13  ;;  %s55_s10 = int_to_ptr.vmem [resolvable:$true] %s54_s10 }
  0x36   :  { %p1145_p11 = scmp.lt.u32.totalorder %s1141_s13, %s1385_s4 }
  0x38   :  { %p1147_p12 = pnand %p1145_p11, %p1142_p10 }
  0x3a   :  { %1150 = shalt.err (!%p1147_p12)
}
  0x3b   :  { %s1151_s18 = scalar_lea.vmem %s55_s10, 512  ;;  %p1156_p0 = scmp.lt.s32.totalorder %s55_s10, %s55_s10 }
  0x3c   :  { %p1152_p13 = scmp.ne.s32.totalorder %s55_s10, %s1151_s18  ;;  %p1157_p1 = scmp.lt.s32.totalorder %s1151_s18, %s1151_s18 }
  0x3e   :  { %p1158_p2 = por %p1157_p1, %p1156_p0 }
  0x40   :  { %p1159_p3 = pnand %p1158_p2, %p1152_p13 }
  0x42   :  { %1162 = shalt.err (!%p1159_p3)
}
  0x43   :  { %60 = dma.hbm_to_vmem [thread:$0]  %s1385_s4, 512, %s55_s10, [#allocation9], %s1196_s0, %s1196_s0, %s1197_s24  }
  0x44   :  { %1185 = dma.done.wait [#allocation3], 128  }
  0x45   :  { %1186 = vsyncadd [#allocation3], 4294967168 }
  0x46   :  { %1187 = dma.done.wait [#allocation6], 640  }
  0x47   :  { %1188 = vsyncadd [#allocation6], 4294966656 }
  0x48   :  { %1189 = dma.done.wait [#allocation9], 512  }
  0x49   :  { %1190 = vsyncadd [#allocation9], 4294966784  ;;  %v1199_v0 = vmov 0.0|0.0   ;;  %vm1200_vm0 = vmmov 0   ;;  %v1201_v1 = vmov 0.0   ;;  %v163_v2 = vld [vmem:[#allocation8] sm:$0xff] }
  0x4a   :  { %1039 = vmatprep.subr.bf16.mxu1 %v1199_v0  ;;  %1033 = vmatprep.subr.bf16.mxu0 %v1199_v0  ;;  %v164_v3 = vld [vmem:[#allocation8 + $0x8] sm:$0xff]  ;;  %v77_v4 = vld [vmem:[#allocation7] sm:$0xff]  ;;  %v165_v7 = vld [vmem:[#allocation8 + $0x10] sm:$0xff]  ;;  %vm88_vm1 = vcmask 261120   ;;  %vm261_vm2 = vcmask 64512   ;;  %s1202_s22 = smov 112  }
  0x4b   :  { %990 = vmatprep.mubr.msk.f32.mxu1 %vm1200_vm0, %v1201_v1  ;;  %979 = vmatprep.mubr.msk.f32.mxu0 %vm1200_vm0, %v1201_v1  ;;  %v1040_v5 = vpack.c.bf16 %v164_v3, %v163_v2  ;;  %v78_v6 = vld [vmem:[#allocation7 + $0x8] sm:$0xff]  ;;  %v166_v8 = vld [vmem:[#allocation8 + $0x18] sm:$0xff]  ;;  %v79_v10 = vld [vmem:[#allocation7 + $0x10] sm:$0xff]  ;;  %s1203_s23 = smov 120   ;;  %s1206_s25 = smov [#allocation10]  }
  0x4c   :  { %v1034_v9 = vpack.c.bf16 %v78_v6, %v77_v4  ;;  %v80_v11 = vld [vmem:[#allocation7 + $0x18] sm:$0xff]  ;;  %v1043_v12 = vpack.c.bf16 %v166_v8, %v165_v7  ;;  %v75_v14 = vld [vmem:[#allocation2] sm:$0xff]  ;;  %s915_s26 = sshll.u32 %s1206_s25, 4  ;;  %s916_s26 = int_to_ptr.vmem [resolvable:$true] %s915_s26 }
  0x4d   :  { %1041 = vmatpush3.bf16.msra.mxu1 %v1040_v5  ;;  %v1037_v13 = vpack.c.bf16 %v80_v11, %v79_v10  ;;  %v76_v15 = vld [vmem:[#allocation5] sm:$0xff]  ;;  %v931_v16 = vld [vmem:[%s1386_s5] ss:$0 sm:$0xff]  ;;  %s1204_s5 = smov 104   ;;  %s1163_s27 = scalar_lea.vmem %s916_s26, 512 }
  0x4e   :  { %1035 = vmatpush3.bf16.msra.mxu0 %v1034_v9  ;;  %1042 = vmatprep.subr.bf16.mxu1 %v1199_v0  ;;  %v929_v17 = vld [vmem:[%s1384_s3] ss:$0 sm:$0xff]  ;;  %s1205_s3 = smov 96   ;;  %p1164_p4 = scmp.ne.s32.totalorder %s916_s26, %s1163_s27 }
  0x4f   :  { %1036 = vmatprep.subr.bf16.mxu0 %v1199_v0  ;;  %p1168_p5 = scmp.lt.s32.totalorder %s916_s26, %s916_s26  ;;  %p1169_p6 = scmp.lt.s32.totalorder %s1163_s27, %s1163_s27 }
  0x51   :  { %1044 = vmatpush3.bf16.msra.mxu1 %v1043_v12  ;;  %p1170_p7 = por %p1169_p6, %p1168_p5 }
  0x52   :  { %1038 = vmatpush3.bf16.msra.mxu0 %v1037_v13  ;;  %998 = vmatprep.subr.mxu1 %v1201_v1 }
  0x53   :  { %993 = vmatprep.subr.mxu0 %v1201_v1  ;;  %p1171_p8 = pnand %p1170_p7, %p1164_p4 }
  0x54   :  { %991 = vmatmul.mubr.msk.f32.vlgmr.msra.gmra.mrb[0].mxu1 %vm88_vm1, %v75_v14 }
  0x55   :  { %980 = vmatmul.mubr.msk.f32.vlgmr.msra.gmra.mrb[0].mxu0 %vm88_vm1, %v76_v15  ;;  %1000 = vmatprep.mubr.msk.f32.mxu1 %vm1200_vm0, %v1201_v1 }
  0x56   :  { %995 = vmatprep.mubr.msk.f32.mxu0 %vm1200_vm0, %v1201_v1 }
 0x127   :  { %v243_v18 = vpop.f32.mrb[0].mxu1 }
 0x128   :  { %v244_v19 = vadd.f32 %v931_v16, %v243_v18  ;;  %v158_v20 = vpop.f32.mrb[0].mxu0  ;;  %v992_v21 = vpop.f32.mrb[1].mxu1 }
 0x129   :  { %v159_v22 = vadd.f32 %v929_v17, %v158_v20  ;;  %v981_v23 = vpop.f32.mrb[1].mxu0 }
 0x12a   :  { %257 = vrot.lane.b32.xlu1 %v244_v19, %s1202_s22  ;;  %255 = vrot.lane.b32.xlu0 %v244_v19, %s1203_s23 }
 0x12b   :  { %v162_v24 = vmul.f32 0.35355338, %v159_v22  ;;  %994 = vmatpush3.xpose.msk.msra.mxu0 %vm261_vm2, %v244_v19 }
 0x12c   :  { %1003 = vmatprep.subr.mxu0 %v1201_v1 }
 0x12e   :  { %996 = vmatmul.mubr.msk.f32.vlgmr.msra.gmra.mrb[2].mxu0 %vm261_vm2, %v162_v24  ;;  %259 = vrot.lane.b32.xlu1 %v244_v19, %s1204_s5 }
 0x12f   :  { %248 = vrot.lane.b32.xlu0 %v162_v24, %s1203_s23  ;;  %1005 = vmatprep.mubr.msk.f32.mxu0 %vm1200_vm0, %v1201_v1 }
 0x132   :  { %252 = vrot.lane.b32.xlu1 %v162_v24, %s1204_s5 }
 0x133   :  { %250 = vrot.lane.b32.xlu0 %v162_v24, %s1202_s22 }
 0x19c   :  { %v1317_v25 = vpop.permute.xlu1 %257  ;;  %v1319_v26 = vpop.permute.xlu0 %255 }
 0x19d   :  { %999 = vmatpush3.xpose.msk.msra.mxu1 %vm261_vm2, %v1319_v26  ;;  %1004 = vmatpush3.xpose.msk.msra.mxu0 %vm261_vm2, %v1317_v25 }
 0x19e   :  { %1008 = vmatprep.subr.mxu1 %v1201_v1  ;;  %1013 = vmatprep.subr.mxu0 %v1201_v1 }
 0x1a0   :  { %v260_v27 = vpop.permute.xlu1 %259 }
 0x1a1   :  { %v249_v28 = vpop.permute.xlu0 %248 }
 0x1a2   :  { %1001 = vmatmul.mubr.msk.f32.vlgmr.msra.gmra.mrb[2].mxu1 %vm261_vm2, %v249_v28 }
 0x1a3   :  { %1009 = vmatpush3.xpose.msk.msra.mxu1 %vm261_vm2, %v260_v27  ;;  %1010 = vmatprep.mubr.msk.f32.mxu1 %vm1200_vm0, %v1201_v1 }
 0x1a4   :  { %v253_v29 = vpop.permute.xlu1 %252  ;;  %1018 = vmatprep.subr.mxu1 %v1201_v1 }
 0x1a5   :  { %v251_v30 = vpop.permute.xlu0 %250 }
 0x1a6   :  { %1006 = vmatmul.mubr.msk.f32.vlgmr.msra.gmra.mrb[4].mxu0 %vm261_vm2, %v251_v30  ;;  %1011 = vmatmul.mubr.msk.f32.vlgmr.msra.gmra.mrb[4].mxu1 %vm261_vm2, %v253_v29 }
 0x1a7   :  { %1015 = vmatprep.mubr.msk.f32.mxu0 %vm1200_vm0, %v1201_v1  ;;  %1020 = vmatprep.mubr.msk.f32.mxu1 %vm1200_vm0, %v1201_v1 }
 0x201   :  { %v332_v31 = vpop.f32.mrb[2].mxu0 }
 0x202   :  { %v997_v32 = vpop.f32.mrb[3].mxu0  ;;  %v558_v33 = vsel %vm261_vm2, %v332_v31, -inf }
 0x203   :  { %559 = vmax.xlane.f32.xlu0 %v558_v33 }
 0x275   :  { %v406_v34 = vpop.f32.mrb[2].mxu1 }
 0x276   :  { %v1002_v35 = vpop.f32.mrb[3].mxu1  ;;  %v561_v36 = vsel %vm261_vm2, %v406_v34, -inf }
 0x277   :  { %562 = vmax.xlane.f32.xlu1 %v561_v36 }
 0x279   :  { %v480_v37 = vpop.f32.mrb[4].mxu0  ;;  %v554_v38 = vpop.f32.mrb[4].mxu1 }
 0x27a   :  { %v1007_v39 = vpop.f32.mrb[5].mxu0  ;;  %v1012_v40 = vpop.f32.mrb[5].mxu1  ;;  %v564_v41 = vsel %vm261_vm2, %v480_v37, -inf  ;;  %v567_v42 = vsel %vm261_vm2, %v554_v38, -inf }
 0x27b   :  { %565 = vmax.xlane.f32.xlu0 %v564_v41 }
 0x27f   :  { %568 = vmax.xlane.f32.xlu0 %v567_v42 }
 0x288   :  { %602 = vrot.lane.b32.xlu1 %v244_v19, %s1205_s3 }
 0x290   :  { %v560_v43 = vpop.xlane.xlu0 %559 }
 0x291   :  { %v570_v44 = vsub.f32 %v332_v31, %v560_v43 }
 0x293   :  { %v574_v45 = vmul.f32 1.442695, %v570_v44 }
 0x295   :  { %1059 = vpow2.f32 %v574_v45 }
 0x29f   :  { %v1060_v46 = vpop.eup %1059 }
 0x2a0   :  { %v582_v47 = vsel %vm261_vm2, %v1060_v46, 0.0 }
 0x2ac   :  { %583 = vadd.xlane.f32.xlu1 %v582_v47 }
 0x304   :  { %v563_v48 = vpop.xlane.xlu1 %562 }
 0x305   :  { %v571_v49 = vsub.f32 %v406_v34, %v563_v48 }
 0x307   :  { %v576_v50 = vmul.f32 1.442695, %v571_v49 }
 0x308   :  { %v566_v51 = vpop.xlane.xlu0 %565  ;;  %v603_v52 = vpop.permute.xlu1 %602 }
 0x309   :  { %1061 = vpow2.f32 %v576_v50  ;;  %v572_v53 = vsub.f32 %v480_v37, %v566_v51  ;;  %1014 = vmatpush3.msra.mxu0 %v603_v52 }
 0x30a   :  { %1023 = vmatprep.subr.mxu0 %v1201_v1 }
 0x30b   :  { %v578_v54 = vmul.f32 1.442695, %v572_v53 }
 0x30c   :  { %v569_v55 = vpop.xlane.xlu0 %568 }
 0x30d   :  { %1063 = vpow2.f32 %v578_v54  ;;  %v573_v56 = vsub.f32 %v554_v38, %v569_v55 }
 0x30f   :  { %v580_v57 = vmul.f32 1.442695, %v573_v56 }
 0x311   :  { %1065 = vpow2.f32 %v580_v57 }
 0x313   :  { %v1062_v58 = vpop.eup %1061 }
 0x314   :  { %v585_v59 = vsel %vm261_vm2, %v1062_v58, 0.0 }
 0x315   :  { %586 = vadd.xlane.f32.xlu0 %v585_v59 }
 0x317   :  { %v1064_v60 = vpop.eup %1063 }
 0x318   :  { %v588_v61 = vsel %vm261_vm2, %v1064_v60, 0.0 }
 0x319   :  { %589 = vadd.xlane.f32.xlu1 %v588_v61 }
 0x31b   :  { %v1066_v62 = vpop.eup %1065 }
 0x31c   :  { %v591_v63 = vsel %vm261_vm2, %v1066_v62, 0.0 }
 0x31d   :  { %592 = vadd.xlane.f32.xlu0 %v591_v63 }
 0x32a   :  { %754 = vrot.lane.b32.xlu1 %v1317_v25, %s1205_s3 }
 0x32e   :  { %830 = vrot.lane.b32.xlu1 %v260_v27, %s1205_s3 }
 0x333   :  { %678 = vrot.lane.b32.xlu0 %v1319_v26, %s1205_s3 }
 0x339   :  { %v584_v0 = vpop.xlane.xlu1 %583 }
 0x33a   :  { %1067 = vrcp.f32 %v584_v0 }
 0x344   :  { %v1068_v2 = vpop.eup %1067 }
 0x345   :  { %v598_v3 = vmul.f32 %v1068_v2, %v1060_v46 }
 0x347   :  { %1016 = vmatmul.mubr.msk.f32.vlgmr.msra.gmra.mrb[6].mxu0 %vm261_vm2, %v598_v3 }
 0x348   :  { %1025 = vmatprep.mubr.msk.f32.mxu0 %vm1200_vm0, %v1201_v1 }
 0x3a2   :  { %v587_v4 = vpop.xlane.xlu0 %586 }
 0x3a3   :  { %1069 = vrcp.f32 %v587_v4 }
 0x3a6   :  { %v590_v5 = vpop.xlane.xlu1 %589 }
 0x3a7   :  { %1071 = vrcp.f32 %v590_v5 }
 0x3aa   :  { %v755_v6 = vpop.permute.xlu1 %754  ;;  %v593_v7 = vpop.xlane.xlu0 %592 }
 0x3ab   :  { %1073 = vrcp.f32 %v593_v7  ;;  %1024 = vmatpush3.msra.mxu0 %v755_v6 }
 0x3ad   :  { %v1070_v8 = vpop.eup %1069 }
 0x3ae   :  { %v599_v9 = vmul.f32 %v1070_v8, %v1062_v58  ;;  %v679_v10 = vpop.permute.xlu0 %678  ;;  %v831_v11 = vpop.permute.xlu1 %830 }
 0x3af   :  { %1019 = vmatpush3.msra.mxu1 %v679_v10 }
 0x3b0   :  { %1021 = vmatmul.mubr.msk.f32.vlgmr.msra.gmra.mrb[6].mxu1 %vm261_vm2, %v599_v9  ;;  %1028 = vmatprep.subr.mxu1 %v1201_v1 }
 0x3b1   :  { %v1072_v12 = vpop.eup %1071  ;;  %1029 = vmatpush3.msra.mxu1 %v831_v11  ;;  %1030 = vmatprep.mubr.msk.f32.mxu1 %vm1200_vm0, %v1201_v1 }
 0x3b2   :  { %v600_v13 = vmul.f32 %v1072_v12, %v1064_v60 }
 0x3b4   :  { %1026 = vmatmul.mubr.msk.f32.vlgmr.msra.gmra.mrb[8].mxu0 %vm261_vm2, %v600_v13 }
 0x3b5   :  { %v1074_v14 = vpop.eup %1073 }
 0x3b6   :  { %v601_v15 = vmul.f32 %v1074_v14, %v1066_v62 }
 0x3b8   :  { %1031 = vmatmul.mubr.msk.f32.vlgmr.msra.gmra.mrb[8].mxu1 %vm261_vm2, %v601_v15 }
 0x41a   :  { %v674_v16 = vpop.f32.mrb[6].mxu0 }
 0x41b   :  { %906 = vst.msk [vmem:[#allocation10] sm:$0xff] %vm261_vm2, %v674_v16  ;;  %v1017_v17 = vpop.f32.mrb[7].mxu0 }
 0x483   :  { %v750_v18 = vpop.f32.mrb[6].mxu1 }
 0x484   :  { %907 = vst.msk [vmem:[#allocation10 + $0x8] sm:$0xff] %vm261_vm2, %v750_v18  ;;  %v1022_v19 = vpop.f32.mrb[7].mxu1 }
 0x487   :  { %v826_v20 = vpop.f32.mrb[8].mxu0 }
 0x488   :  { %908 = vst.msk [vmem:[#allocation10 + $0x10] sm:$0xff] %vm261_vm2, %v826_v20  ;;  %v1027_v1 = vpop.f32.mrb[9].mxu0 }
 0x48b   :  { %v902_v21 = vpop.f32.mrb[8].mxu1 }
 0x48c   :  { %909 = vst.msk [vmem:[#allocation10 + $0x18] sm:$0xff] %vm261_vm2, %v902_v21  ;;  %v1032_v22 = vpop.f32.mrb[9].mxu1 }
 0x48d   :  { %1174 = shalt.err (!%p1171_p8)
}
 0x48e   :  { %s1175_s30 = scalar_lea.hbm %s1387_s6, 512 }
 0x48f   :  { %p1176_p9 = scmp.ne.s32.totalorder %s1387_s6, %s1175_s30  ;;  %p1179_p10 = scmp.lt.u32.totalorder %s1175_s30, %s1387_s6 }
 0x491   :  { %p1181_p11 = pnand %p1179_p10, %p1176_p9 }
 0x493   :  { %1184 = shalt.err (!%p1181_p11)
}
 0x494   :  { %921 = dma.vmem_to_hbm [thread:$0]  %s916_s26, 512, %s1387_s6, [#allocation4], %s1196_s0, %s1196_s0, %s1197_s24  }
 0x495   :  { %1191 = dma.done.wait [#allocation4], 512  }
 0x496   :  { %1192 = vsyncadd [#allocation4], 4294966784 }
 0x497   :  { %925 = vsyncpa [#allocation3], 1 }
 0x498   :  { %926 = vsyncpa [#allocation6], 1 }
 0x499   :  { %927 = vsyncpa [#allocation9], 1 }
 0x49a   :  { %928 = vsyncpa [#allocation4], 1 }

</bundles_post_ra>
